<compile_context>
chip_gen: v7x
topology: tpu7x:2x2x1
jax: 0.10.0
libtpu: 0.0.40
codegen_flags: <defaults>
</compile_context>

<pallas_src>
import functools

import jax
import jax.numpy as jnp
from jax.experimental import pallas as pl
from jax.experimental.pallas import tpu as pltpu

_LANE = 128     # lane width (last dim) for f32 vregs
_SUBLANE = 8    # sublane multiple (second-to-last dim) for f32


def _round_up(v, m):
    return (v + m - 1) // m * m


def _mlp_kernel(num_layers, bias_slices, *refs):
    """Fused MLP forward on one batch tile.

    refs = (x_tile, w0, ..., w_{L-1}, bias_concat, out_tile); everything padded
    so each matmul is a full (TB, 128k) x (128k, 128m) MXU tile.
    """
    x_ref = refs[0]
    w_refs = refs[1:1 + num_layers]
    b_ref = refs[1 + num_layers]
    out_ref = refs[-1]

    h = x_ref[...]                                   # (TB, F0_pad) f32
    for i in range(num_layers):
        start, width = bias_slices[i]                # static, lane-aligned
        b = b_ref[:, start:start + width]            # (1, Fi+1_pad)
        h = jnp.dot(h, w_refs[i][...],
                    preferred_element_type=jnp.float32) + b
        if i < num_layers - 1:
            h = jnp.maximum(h, 0.0)                  # ReLU on VPU
    out_ref[...] = h.astype(out_ref.dtype)           # full 128-wide store


def mlp_forward(x, weights, biases, *, block_batch=512):
    """Run the fused MLP Pallas kernel.

    x:       (B, F_in) float32
    weights: list of (F_i, F_{i+1}) float32
    biases:  list of (F_{i+1},) or (1, F_{i+1}) float32
    returns: (B, 1) float32 logits
    """
    num_layers = len(weights)
    B, F_in = x.shape
    feats = [F_in] + [w.shape[1] for w in weights]
    feats_p = [_round_up(f, _LANE) for f in feats]

    # Batch tile: multiple of 8 sublanes; big enough to amortize per-step
    # overhead when B is large, but no larger than needed for tiny B.
    TB = _round_up(min(block_batch, _round_up(B, _SUBLANE)), _SUBLANE)
    B_pad = _round_up(B, TB)

    # Zero-pad once in the wrapper (semantics-preserving: padded x columns are
    # zero, padded weight rows/cols and bias entries are zero -> padded output
    # columns stay zero through ReLU).
    x_p = jnp.zeros((B_pad, feats_p[0]), jnp.float32).at[:B, :F_in].set(x)

    w_ps, b_segs = [], []
    for i, (w, b) in enumerate(zip(weights, biases)):
        wp = (jnp.zeros((feats_p[i], feats_p[i + 1]), jnp.float32)
              .at[:feats[i], :feats[i + 1]].set(w))
        bp = (jnp.zeros((1, feats_p[i + 1]), jnp.float32)
              .at[:, :feats[i + 1]].set(jnp.reshape(b, (1, -1))))
        w_ps.append(wp)
        b_segs.append(bp)
    bias_concat = jnp.concatenate(b_segs, axis=1)    # (1, sum Fpad)

    bias_slices, off = [], 0
    for i in range(num_layers):
        bias_slices.append((off, feats_p[i + 1]))
        off += feats_p[i + 1]
    bias_slices = tuple(bias_slices)

    grid = (B_pad // TB,)

    # x / out stream per grid step; weights + biases stay VMEM-resident.
    in_specs = [pl.BlockSpec((TB, feats_p[0]), lambda i: (i, 0))]
    for wp in w_ps:
        in_specs.append(pl.BlockSpec(wp.shape, lambda i: (0, 0)))
    in_specs.append(pl.BlockSpec(bias_concat.shape, lambda i: (0, 0)))
    out_spec = pl.BlockSpec((TB, feats_p[-1]), lambda i: (i, 0))

    flops = 2 * B_pad * sum(feats_p[i] * feats_p[i + 1]
                            for i in range(num_layers))
    bytes_accessed = 4 * (x_p.size + sum(wp.size for wp in w_ps)
                          + bias_concat.size + B_pad * feats_p[-1])

    # VMEM budget: double-buffered x/out tiles + resident params + live h,
    # with 2x headroom; capped at 48 MiB (fits v7x 64 MiB and v5e/v6e 128 MiB).
    vmem_needed = (2 * TB * feats_p[0] * 4
                   + 2 * TB * feats_p[-1] * 4
                   + 4 * (sum(wp.size for wp in w_ps) + bias_concat.size)
                   + 2 * TB * max(feats_p) * 4)
    vmem_limit = int(min(max(2 * vmem_needed, 8 << 20), 48 << 20))

    kernel = functools.partial(_mlp_kernel, num_layers, bias_slices)

    out_p = pl.pallas_call(
        kernel,
        out_shape=jax.ShapeDtypeStruct((B_pad, feats_p[-1]), jnp.float32),
        grid=grid,
        in_specs=in_specs,
        out_specs=out_spec,
        compiler_params=pltpu.CompilerParams(
            dimension_semantics=("parallel",),
            vmem_limit_bytes=vmem_limit),
        cost_estimate=pl.CostEstimate(
            flops=flops, transcendentals=0, bytes_accessed=bytes_accessed),
    )(x_p, *w_ps, bias_concat)

    return out_p[:B, :feats[-1]]                     # (B, 1)


def init_mlp_params(key, num_layers, num_features_in, num_features_hidden):
    """Deterministic init mimicking torch.nn.Linear (U(-1/sqrt(fan_in), ...))."""
    if isinstance(num_features_hidden, int):
        num_features_hidden = [num_features_hidden] * (num_layers - 1)
    num_features = [num_features_in] + list(num_features_hidden) + [1]

    weights, biases = [], []
    for i in range(num_layers):
        fan_in, fan_out = num_features[i], num_features[i + 1]
        key, kw, kb = jax.random.split(key, 3)
        bound = 1.0 / (fan_in ** 0.5)
        w = jax.random.uniform(kw, (fan_in, fan_out), jnp.float32, -bound, bound)
        b = jax.random.uniform(kb, (1, fan_out), jnp.float32, -bound, bound)
        weights.append(w)
        biases.append(b)
    return weights, biases


def mlp_reference(x, weights, biases):
    """Pure-JAX reference for correctness check."""
    h = x
    L = len(weights)
    for i in range(L):
        h = h @ weights[i] + jnp.reshape(biases[i], (1, -1))
        if i < L - 1:
            h = jnp.maximum(h, 0.0)
    return h


if __name__ == "__main__":
    key = jax.random.PRNGKey(0)

    # Small shapes consistent with the module:
    #   num_layers=3, num_features_in=16, num_features_hidden=32, out=1
    num_layers = 3
    num_features_in = 16
    num_features_hidden = 32
    batch = 2

    key, kx = jax.random.split(key)
    x = jax.random.normal(kx, (batch, num_features_in), jnp.float32)

    weights, biases = init_mlp_params(
        key, num_layers, num_features_in, num_features_hidden)

    logits = mlp_forward(x, weights, biases)
    logits = jax.block_until_ready(logits)

    ref = mlp_reference(x, weights, biases)
    assert logits.shape == (batch, 1)
    assert jnp.allclose(logits, ref, atol=1e-5, rtol=1e-5), (
        float(jnp.max(jnp.abs(logits - ref))))

    # predict/classify equivalents (plain JAX glue, matching the module API):
    predicted = jax.nn.sigmoid(logits)
    classified = (predicted > 0.5).astype(jnp.float32)
    jax.block_until_ready(classified)

    print("KERNEL_OK")
</pallas_src>

<mosaic_0001>
module attributes {stable_mosaic.version = 11 : i64} {
  func.func @_mlp_kernel(%arg0: i32, %arg1: memref<8x128xf32, #tpu.memory_space<vmem>>, %arg2: memref<128x128xf32, #tpu.memory_space<vmem>>, %arg3: memref<128x128xf32, #tpu.memory_space<vmem>>, %arg4: memref<128x128xf32, #tpu.memory_space<vmem>>, %arg5: memref<1x384xf32, #tpu.memory_space<vmem>>, %arg6: memref<8x128xf32, #tpu.memory_space<vmem>>) attributes {dimension_semantics = [#tpu.dimension_semantics<parallel>], iteration_bounds = array<i64: 1>, scalar_prefetch = 0 : i64, scratch_operands = 0 : i64, tpu.core_type = #tpu.core_type<tc>, window_params = [{transform_indices = @transform_0, window_bounds = array<i64: 8, 128>}, {pipeline_mode = #tpu.pipeline_mode<synchronous>, transform_indices = @transform_1, window_bounds = array<i64: 128, 128>}, {pipeline_mode = #tpu.pipeline_mode<synchronous>, transform_indices = @transform_2, window_bounds = array<i64: 128, 128>}, {pipeline_mode = #tpu.pipeline_mode<synchronous>, transform_indices = @transform_3, window_bounds = array<i64: 128, 128>}, {pipeline_mode = #tpu.pipeline_mode<synchronous>, transform_indices = @transform_4, window_bounds = array<i64: 1, 384>}, {transform_indices = @transform_5, window_bounds = array<i64: 8, 128>}]} {
    %c0 = arith.constant 0 : index
    %c0_0 = arith.constant 0 : index
    %0 = vector.load %arg1[%c0, %c0_0] : memref<8x128xf32, #tpu.memory_space<vmem>>, vector<8x128xf32>
    %c0_1 = arith.constant 0 : index
    %c0_2 = arith.constant 0 : index
    %1 = vector.load %arg5[%c0_1, %c0_2] : memref<1x384xf32, #tpu.memory_space<vmem>>, vector<1x128xf32>
    %c0_3 = arith.constant 0 : index
    %c0_4 = arith.constant 0 : index
    %2 = vector.load %arg2[%c0_3, %c0_4] : memref<128x128xf32, #tpu.memory_space<vmem>>, vector<128x128xf32>
    %cst = arith.constant dense<0.000000e+00> : vector<8x128xf32>
    %3 = tpu.matmul %0, %2, %cst {dimension_numbers = #tpu.dot_dimension_numbers<[1], [0], [0], [1], [0, 0, 1, 1], [], []>} : vector<8x128xf32>, vector<128x128xf32>, vector<8x128xf32> -> vector<8x128xf32>
    %4 = vector.broadcast %1 : vector<1x128xf32> to vector<8x128xf32>
    %5 = arith.addf %3, %4 : vector<8x128xf32>
    %cst_5 = arith.constant 0.000000e+00 : f32
    %6 = vector.broadcast %cst_5 : f32 to vector<8x128xf32>
    %7 = arith.maximumf %5, %6 : vector<8x128xf32>
    %c0_6 = arith.constant 0 : index
    %c128 = arith.constant 128 : index
    %8 = vector.load %arg5[%c0_6, %c128] : memref<1x384xf32, #tpu.memory_space<vmem>>, vector<1x128xf32>
    %c0_7 = arith.constant 0 : index
    %c0_8 = arith.constant 0 : index
    %9 = vector.load %arg3[%c0_7, %c0_8] : memref<128x128xf32, #tpu.memory_space<vmem>>, vector<128x128xf32>
    %cst_9 = arith.constant dense<0.000000e+00> : vector<8x128xf32>
    %10 = tpu.matmul %7, %9, %cst_9 {dimension_numbers = #tpu.dot_dimension_numbers<[1], [0], [0], [1], [0, 0, 1, 1], [], []>} : vector<8x128xf32>, vector<128x128xf32>, vector<8x128xf32> -> vector<8x128xf32>
    %11 = vector.broadcast %8 : vector<1x128xf32> to vector<8x128xf32>
    %12 = arith.addf %10, %11 : vector<8x128xf32>
    %cst_10 = arith.constant 0.000000e+00 : f32
    %13 = vector.broadcast %cst_10 : f32 to vector<8x128xf32>
    %14 = arith.maximumf %12, %13 : vector<8x128xf32>
    %c0_11 = arith.constant 0 : index
    %c256 = arith.constant 256 : index
    %15 = vector.load %arg5[%c0_11, %c256] : memref<1x384xf32, #tpu.memory_space<vmem>>, vector<1x128xf32>
    %c0_12 = arith.constant 0 : index
    %c0_13 = arith.constant 0 : index
    %16 = vector.load %arg4[%c0_12, %c0_13] : memref<128x128xf32, #tpu.memory_space<vmem>>, vector<128x128xf32>
    %cst_14 = arith.constant dense<0.000000e+00> : vector<8x128xf32>
    %17 = tpu.matmul %14, %16, %cst_14 {dimension_numbers = #tpu.dot_dimension_numbers<[1], [0], [0], [1], [0, 0, 1, 1], [], []>} : vector<8x128xf32>, vector<128x128xf32>, vector<8x128xf32> -> vector<8x128xf32>
    %18 = vector.broadcast %15 : vector<1x128xf32> to vector<8x128xf32>
    %19 = arith.addf %17, %18 : vector<8x128xf32>
    %c0_15 = arith.constant 0 : index
    %c0_16 = arith.constant 0 : index
    %20 = vector.load %arg6[%c0_15, %c0_16] : memref<8x128xf32, #tpu.memory_space<vmem>>, vector<8x128xf32>
    tpu.vector_store %arg6[%c0_15, %c0_16], %19 {strides = array<i32>} : memref<8x128xf32, #tpu.memory_space<vmem>>, vector<8x128xf32>,
    return
  }
  func.func @transform_0(%arg0: i32) -> (i32, i32) {
    %c0_i32 = arith.constant 0 : i32
    %c0_i32_0 = arith.constant 0 : i32
    return %arg0, %c0_i32 : i32, i32
  }
  func.func @transform_1(%arg0: i32) -> (i32, i32) {
    %c0_i32 = arith.constant 0 : i32
    %c0_i32_0 = arith.constant 0 : i32
    %c0_i32_1 = arith.constant 0 : i32
    return %c0_i32, %c0_i32_0 : i32, i32
  }
  func.func @transform_2(%arg0: i32) -> (i32, i32) {
    %c0_i32 = arith.constant 0 : i32
    %c0_i32_0 = arith.constant 0 : i32
    %c0_i32_1 = arith.constant 0 : i32
    return %c0_i32, %c0_i32_0 : i32, i32
  }
  func.func @transform_3(%arg0: i32) -> (i32, i32) {
    %c0_i32 = arith.constant 0 : i32
    %c0_i32_0 = arith.constant 0 : i32
    %c0_i32_1 = arith.constant 0 : i32
    return %c0_i32, %c0_i32_0 : i32, i32
  }
  func.func @transform_4(%arg0: i32) -> (i32, i32) {
    %c0_i32 = arith.constant 0 : i32
    %c0_i32_0 = arith.constant 0 : i32
    %c0_i32_1 = arith.constant 0 : i32
    return %c0_i32, %c0_i32_0 : i32, i32
  }
  func.func @transform_5(%arg0: i32) -> (i32, i32) {
    %c0_i32 = arith.constant 0 : i32
    %c0_i32_0 = arith.constant 0 : i32
    return %arg0, %c0_i32 : i32, i32
  }
}

</mosaic_0001>

<bundles_post_ra>
// kernel: tpu_custom_call.1
= control target key start
LH: loop header
LB: loop body
LE: loop exit
PB: predicated region body
PF: predicated region fallthrough
CT: control target
= control target key end

     0   :  { %10 = vsyncpa [#allocation3], 0  ;;  %s881_s0 = inlined_call_operand.hbm [shape: f32[8,128], index: 0, kind: input, shape index: {}]   ;;  %s882_s1 = inlined_call_operand.hbm [shape: f32[128,128], index: 1, kind: input, shape index: {}]   ;;  %s883_s2 = inlined_call_operand.hbm [shape: f32[128,128], index: 2, kind: input, shape index: {}]   ;;  %s884_s3 = inlined_call_operand.hbm [shape: f32[128,128], index: 3, kind: input, shape index: {}]   ;;  %s885_s4 = inlined_call_operand.vmem [shape: f32[1,384], index: 4, kind: input, shape index: {}]   ;;  %s886_s5 = inlined_call_operand.hbm [shape: f32[8,128], index: 5, kind: output, shape index: {}]  }
   0x1   :  { %11 = vsyncpa [#allocation6], 0 }
   0x2   :  { %12 = vsyncpa [#allocation9], 0 }
   0x3   :  { %13 = vsyncpa [#allocation4], 0  ;;  %s733_s18 = smov [#allocation5]   ;;  %s615_s22 = scalar_lea.hbm %s882_s1, 2048 }
   0x4   :  { %s29_s19 = sshll.u32 %s733_s18, 4  ;;  %p616_p0 = scmp.ne.s32.totalorder %s882_s1, %s615_s22  ;;  %s30_s19 = int_to_ptr.vmem [resolvable:$true] %s29_s19 }
   0x5   :  { %p619_p1 = scmp.lt.u32.totalorder %s615_s22, %s882_s1 }
   0x7   :  { %p621_p2 = pnand %p619_p1, %p616_p0 }
   0x9   :  { %624 = shalt.err (!%p621_p2)
}
   0xa   :  { %s625_s27 = scalar_lea.vmem %s30_s19, 2048  ;;  %p630_p4 = scmp.lt.s32.totalorder %s30_s19, %s30_s19 }
   0xb   :  { %p626_p3 = scmp.ne.s32.totalorder %s30_s19, %s625_s27  ;;  %p631_p5 = scmp.lt.s32.totalorder %s625_s27, %s625_s27 }
   0xd   :  { %p632_p6 = por %p631_p5, %p630_p4 }
   0xf   :  { %p633_p7 = pnand %p632_p6, %p626_p3 }
  0x11   :  { %636 = shalt.err (!%p633_p7)
}
  0x12   :  { %s734_s28 = smov 128   ;;  %s735_s29 = smov 8  }
  0x13   :  { %35 = dma.hbm_to_vmem [thread:$0]  %s882_s1, 2048, %s30_s19, [#allocation6], %s734_s28, %s734_s28, %s735_s29  }
  0x14   :  { %s736_s7 = smov [#allocation2]   ;;  %s737_s9 = smov [#allocation7]  }
  0x15   :  { %s20_s8 = sshll.u32 %s736_s7, 4  ;;  %s41_s10 = sshll.u32 %s737_s9, 4  ;;  %s21_s8 = int_to_ptr.vmem [resolvable:$true] %s20_s8  ;;  %s42_s10 = int_to_ptr.vmem [resolvable:$true] %s41_s10 }
  0x16   :  { %s637_s13 = scalar_lea.hbm %s881_s0, 128 }
  0x17   :  { %p638_p8 = scmp.ne.s32.totalorder %s881_s0, %s637_s13  ;;  %p641_p9 = scmp.lt.u32.totalorder %s637_s13, %s881_s0 }
  0x19   :  { %p643_p10 = pnand %p641_p9, %p638_p8 }
  0x1b   :  { %646 = shalt.err (!%p643_p10)
}
  0x1c   :  { %s647_s1 = scalar_lea.vmem %s21_s8, 128  ;;  %p652_p12 = scmp.lt.s32.totalorder %s21_s8, %s21_s8 }
  0x1d   :  { %p648_p11 = scmp.ne.s32.totalorder %s21_s8, %s647_s1  ;;  %p653_p13 = scmp.lt.s32.totalorder %s647_s1, %s647_s1 }
  0x1f   :  { %p654_p0 = por %p653_p13, %p652_p12 }
  0x21   :  { %p655_p1 = pnand %p654_p0, %p648_p11 }
  0x23   :  { %658 = shalt.err (!%p655_p1)
}
  0x24   :  { %23 = dma.hbm_to_vmem [thread:$0]  %s881_s0, 128, %s21_s8, [#allocation3]  }
  0x25   :  { %s659_s22 = scalar_lea.hbm %s883_s2, 2048 }
  0x26   :  { %p660_p2 = scmp.ne.s32.totalorder %s883_s2, %s659_s22  ;;  %p663_p3 = scmp.lt.u32.totalorder %s659_s22, %s883_s2 }
  0x28   :  { %p665_p4 = pnand %p663_p3, %p660_p2 }
  0x2a   :  { %668 = shalt.err (!%p665_p4)
}
  0x2b   :  { %s669_s27 = scalar_lea.vmem %s42_s10, 2048  ;;  %p674_p6 = scmp.lt.s32.totalorder %s42_s10, %s42_s10 }
  0x2c   :  { %p670_p5 = scmp.ne.s32.totalorder %s42_s10, %s669_s27  ;;  %p675_p7 = scmp.lt.s32.totalorder %s669_s27, %s669_s27 }
  0x2e   :  { %p676_p8 = por %p675_p7, %p674_p6 }
  0x30   :  { %p677_p9 = pnand %p676_p8, %p670_p5 }
  0x32   :  { %680 = shalt.err (!%p677_p9)
}
  0x33   :  { %47 = dma.hbm_to_vmem [thread:$0]  %s883_s2, 2048, %s42_s10, [#allocation6], %s734_s28, %s734_s28, %s735_s29  }
  0x34   :  { %s738_s6 = smov [#allocation8]   ;;  %s681_s11 = scalar_lea.hbm %s884_s3, 2048 }
  0x35   :  { %s53_s7 = sshll.u32 %s738_s6, 4  ;;  %p682_p10 = scmp.ne.s32.totalorder %s884_s3, %s681_s11  ;;  %s54_s7 = int_to_ptr.vmem [resolvable:$true] %s53_s7 }
  0x36   :  { %p685_p11 = scmp.lt.u32.totalorder %s681_s11, %s884_s3 }
  0x38   :  { %p687_p12 = pnand %p685_p11, %p682_p10 }
  0x3a   :  { %690 = shalt.err (!%p687_p12)
}
  0x3b   :  { %s691_s16 = scalar_lea.vmem %s54_s7, 2048  ;;  %p696_p0 = scmp.lt.s32.totalorder %s54_s7, %s54_s7 }
  0x3c   :  { %p692_p13 = scmp.ne.s32.totalorder %s54_s7, %s691_s16  ;;  %p697_p1 = scmp.lt.s32.totalorder %s691_s16, %s691_s16 }
  0x3e   :  { %p698_p2 = por %p697_p1, %p696_p0 }
  0x40   :  { %p699_p3 = pnand %p698_p2, %p692_p13 }
  0x42   :  { %702 = shalt.err (!%p699_p3)
}
  0x43   :  { %59 = dma.hbm_to_vmem [thread:$0]  %s884_s3, 2048, %s54_s7, [#allocation9], %s734_s28, %s734_s28, %s735_s29  }
  0x44   :  { %725 = dma.done.wait [#allocation3], 128  }
  0x45   :  { %726 = vsyncadd [#allocation3], 4294967168 }
  0x46   :  { %727 = dma.done.wait [#allocation6], 4096  }
  0x47   :  { %728 = vsyncadd [#allocation6], 4294963200 }
  0x48   :  { %729 = dma.done.wait [#allocation9], 2048  }
  0x49   :  { %730 = vsyncadd [#allocation9], 4294965248  ;;  %v739_v0 = vmov 0.0|0.0   ;;  %vm740_vm0 = vmmov 0   ;;  %v741_v1 = vmov 0.0   ;;  %v76_v2 = vld [vmem:[#allocation5] sm:$0xff] }
  0x4a   :  { %533 = vmatprep.subr.bf16.mxu0 %v739_v0  ;;  %460 = vmatprep.mubr.msk.f32.mxu0 %vm740_vm0, %v741_v1  ;;  %v77_v3 = vld [vmem:[#allocation5 + $0x8] sm:$0xff]  ;;  %v78_v4 = vld [vmem:[#allocation5 + $0x10] sm:$0xff]  ;;  %v79_v6 = vld [vmem:[#allocation5 + $0x18] sm:$0xff]  ;;  %s742_s19 = smov [#allocation10]  }
  0x4b   :  { %557 = vmatprep.subr.bf16.mxu1 %v739_v0  ;;  %495 = vmatprep.mubr.msk.f32.mxu1 %vm740_vm0, %v741_v1  ;;  %v534_v5 = vpack.c.bf16 %v77_v3, %v76_v2  ;;  %v537_v7 = vpack.c.bf16 %v79_v6, %v78_v4  ;;  %v80_v8 = vld [vmem:[#allocation5 + $0x20] sm:$0xff]  ;;  %v81_v9 = vld [vmem:[#allocation5 + $0x28] sm:$0xff]  ;;  %v172_v12 = vld [vmem:[#allocation7 + $0x10] sm:$0xff]  ;;  %s363_s20 = sshll.u32 %s742_s19, 4  ;;  %s364_s20 = int_to_ptr.vmem [resolvable:$true] %s363_s20 }
  0x4c   :  { %v170_v10 = vld [vmem:[#allocation7] sm:$0xff]  ;;  %v171_v11 = vld [vmem:[#allocation7 + $0x8] sm:$0xff]  ;;  %v173_v13 = vld [vmem:[#allocation7 + $0x18] sm:$0xff]  ;;  %v540_v14 = vpack.c.bf16 %v81_v9, %v80_v8  ;;  %s703_s21 = scalar_lea.vmem %s364_s20, 128  ;;  %p708_p5 = scmp.lt.s32.totalorder %s364_s20, %s364_s20 }
  0x4d   :  { %535 = vmatpush3.bf16.msra.mxu0 %v534_v5  ;;  %v558_v15 = vpack.c.bf16 %v171_v11, %v170_v10  ;;  %v82_v16 = vld [vmem:[#allocation5 + $0x30] sm:$0xff]  ;;  %v83_v17 = vld [vmem:[#allocation5 + $0x38] sm:$0xff]  ;;  %v561_v18 = vpack.c.bf16 %v173_v13, %v172_v12  ;;  %v174_v19 = vld [vmem:[#allocation7 + $0x20] sm:$0xff]  ;;  %p704_p4 = scmp.ne.s32.totalorder %s364_s20, %s703_s21  ;;  %p709_p6 = scmp.lt.s32.totalorder %s703_s21, %s703_s21 }
  0x4e   :  { %536 = vmatprep.subr.bf16.mxu0 %v739_v0  ;;  %v175_v20 = vld [vmem:[#allocation7 + $0x28] sm:$0xff]  ;;  %v543_v21 = vpack.c.bf16 %v83_v17, %v82_v16  ;;  %v84_v22 = vld [vmem:[#allocation5 + $0x40] sm:$0xff]  ;;  %v176_v25 = vld [vmem:[#allocation7 + $0x30] sm:$0xff] }
  0x4f   :  { %559 = vmatpush3.bf16.msra.mxu1 %v558_v15  ;;  %v85_v23 = vld [vmem:[#allocation5 + $0x48] sm:$0xff]  ;;  %v564_v24 = vpack.c.bf16 %v175_v20, %v174_v19  ;;  %v177_v26 = vld [vmem:[#allocation7 + $0x38] sm:$0xff]  ;;  %v86_v28 = vld [vmem:[#allocation5 + $0x50] sm:$0xff]  ;;  %p710_p7 = por %p709_p6, %p708_p5 }
  0x50   :  { %560 = vmatprep.subr.bf16.mxu1 %v739_v0  ;;  %v546_v27 = vpack.c.bf16 %v85_v23, %v84_v22  ;;  %v87_v29 = vld [vmem:[#allocation5 + $0x58] sm:$0xff]  ;;  %v567_v30 = vpack.c.bf16 %v177_v26, %v176_v25  ;;  %v178_v31 = vld [vmem:[#allocation7 + $0x40] sm:$0xff]  ;;  %v179_v32 = vld [vmem:[#allocation7 + $0x48] sm:$0xff] }
  0x51   :  { %538 = vmatpush3.bf16.msra.mxu0 %v537_v7  ;;  %v549_v33 = vpack.c.bf16 %v87_v29, %v86_v28  ;;  %v88_v34 = vld [vmem:[#allocation5 + $0x60] sm:$0xff]  ;;  %v89_v35 = vld [vmem:[#allocation5 + $0x68] sm:$0xff]  ;;  %v570_v36 = vpack.c.bf16 %v179_v32, %v178_v31  ;;  %v180_v37 = vld [vmem:[#allocation7 + $0x50] sm:$0xff]  ;;  %p711_p8 = pnand %p710_p7, %p704_p4 }
  0x52   :  { %539 = vmatprep.subr.bf16.mxu0 %v739_v0  ;;  %v181_v38 = vld [vmem:[#allocation7 + $0x58] sm:$0xff]  ;;  %v552_v39 = vpack.c.bf16 %v89_v35, %v88_v34  ;;  %v90_v40 = vld [vmem:[#allocation5 + $0x70] sm:$0xff]  ;;  %v182_v43 = vld [vmem:[#allocation7 + $0x60] sm:$0xff] }
  0x53   :  { %562 = vmatpush3.bf16.msra.mxu1 %v561_v18  ;;  %v91_v41 = vld [vmem:[#allocation5 + $0x78] sm:$0xff]  ;;  %v573_v42 = vpack.c.bf16 %v181_v38, %v180_v37  ;;  %v183_v44 = vld [vmem:[#allocation7 + $0x68] sm:$0xff]  ;;  %v184_v48 = vld [vmem:[#allocation7 + $0x70] sm:$0xff] }
  0x54   :  { %563 = vmatprep.subr.bf16.mxu1 %v739_v0  ;;  %v555_v45 = vpack.c.bf16 %v91_v41, %v90_v40  ;;  %v576_v46 = vpack.c.bf16 %v183_v44, %v182_v43  ;;  %v74_v47 = vld [vmem:[#allocation2] sm:$0xff]  ;;  %v264_v51 = vld [vmem:[#allocation8] sm:$0xff]  ;;  %v265_v52 = vld [vmem:[#allocation8 + $0x8] sm:$0xff] }
  0x55   :  { %541 = vmatpush3.bf16.msra.mxu0 %v540_v14  ;;  %v185_v49 = vld [vmem:[#allocation7 + $0x78] sm:$0xff]  ;;  %v266_v53 = vld [vmem:[#allocation8 + $0x10] sm:$0xff]  ;;  %v582_v54 = vpack.c.bf16 %v265_v52, %v264_v51  ;;  %v268_v57 = vld [vmem:[#allocation8 + $0x20] sm:$0xff] }
  0x56   :  { %542 = vmatprep.subr.bf16.mxu0 %v739_v0  ;;  %v579_v50 = vpack.c.bf16 %v185_v49, %v184_v48  ;;  %v267_v55 = vld [vmem:[#allocation8 + $0x18] sm:$0xff]  ;;  %v269_v58 = vld [vmem:[#allocation8 + $0x28] sm:$0xff]  ;;  %v270_v60 = vld [vmem:[#allocation8 + $0x30] sm:$0xff] }
  0x57   :  { %565 = vmatpush3.bf16.msra.mxu1 %v564_v24  ;;  %v585_v56 = vpack.c.bf16 %v267_v55, %v266_v53  ;;  %v588_v59 = vpack.c.bf16 %v269_v58, %v268_v57  ;;  %v271_v61 = vld [vmem:[#allocation8 + $0x38] sm:$0xff]  ;;  %v272_v63 = vld [vmem:[#allocation8 + $0x40] sm:$0xff]  ;;  %v274_v3 = vld [vmem:[#allocation8 + $0x50] sm:$0xff] }
  0x58   :  { %566 = vmatprep.subr.bf16.mxu1 %v739_v0  ;;  %v591_v62 = vpack.c.bf16 %v271_v61, %v270_v60  ;;  %v275_v4 = vld [vmem:[#allocation8 + $0x58] sm:$0xff]  ;;  %v276_v6 = vld [vmem:[#allocation8 + $0x60] sm:$0xff]  ;;  %v277_v7 = vld [vmem:[#allocation8 + $0x68] sm:$0xff] }
  0x59   :  { %544 = vmatpush3.bf16.msra.mxu0 %v543_v21  ;;  %v597_v5 = vpack.c.bf16 %v275_v4, %v274_v3  ;;  %v600_v8 = vpack.c.bf16 %v277_v7, %v276_v6  ;;  %v374_v9 = vld [vmem:[%s885_s4] ss:$0 sm:$0xff]  ;;  %v278_v14 = vld [vmem:[#allocation8 + $0x70] sm:$0xff]  ;;  %v375_v17 = vld [vmem:[%s885_s4 + $0x1] ss:$0 sm:$0xff] }
  0x5a   :  { %545 = vmatprep.subr.bf16.mxu0 %v739_v0  ;;  %v279_v15 = vld [vmem:[#allocation8 + $0x78] sm:$0xff] }
  0x5b   :  { %568 = vmatpush3.bf16.msra.mxu1 %v567_v30  ;;  %v603_v16 = vpack.c.bf16 %v279_v15, %v278_v14  ;;  %v376_v21 = vld [vmem:[%s885_s4 + $0x2] ss:$0 sm:$0xff] }
  0x5c   :  { %569 = vmatprep.subr.bf16.mxu1 %v739_v0 }
  0x5d   :  { %547 = vmatpush3.bf16.msra.mxu0 %v546_v27 }
  0x5e   :  { %548 = vmatprep.subr.bf16.mxu0 %v739_v0 }
  0x5f   :  { %571 = vmatpush3.bf16.msra.mxu1 %v570_v36 }
  0x60   :  { %572 = vmatprep.subr.bf16.mxu1 %v739_v0 }
  0x61   :  { %550 = vmatpush3.bf16.msra.mxu0 %v549_v33 }
  0x62   :  { %551 = vmatprep.subr.bf16.mxu0 %v739_v0 }
  0x63   :  { %574 = vmatpush3.bf16.msra.mxu1 %v573_v42 }
  0x64   :  { %575 = vmatprep.subr.bf16.mxu1 %v739_v0 }
  0x65   :  { %553 = vmatpush3.bf16.msra.mxu0 %v552_v39 }
  0x66   :  { %554 = vmatprep.subr.bf16.mxu0 %v739_v0 }
  0x67   :  { %577 = vmatpush3.bf16.msra.mxu1 %v576_v46 }
  0x68   :  { %578 = vmatprep.subr.bf16.mxu1 %v739_v0 }
  0x69   :  { %556 = vmatpush3.bf16.msra.mxu0 %v555_v45 }
  0x6a   :  { %581 = vmatprep.subr.bf16.mxu0 %v739_v0 }
  0x6b   :  { %580 = vmatpush3.bf16.msra.mxu1 %v579_v50 }
  0x6c   :  { %461 = vmatmul.mubr.f32.vlgmr.msra.gmra.mrb[0].mxu0 %v74_v47 }
  0x6d   :  { %530 = vmatprep.mubr.msk.f32.mxu0 %vm740_vm0, %v741_v1  ;;  %583 = vmatpush3.bf16.msra.mxu0 %v582_v54  ;;  %v273_v1 = vld [vmem:[#allocation8 + $0x48] sm:$0xff] }
  0x6e   :  { %584 = vmatprep.subr.bf16.mxu0 %v739_v0  ;;  %v594_v2 = vpack.c.bf16 %v273_v1, %v272_v63 }
  0x71   :  { %586 = vmatpush3.bf16.msra.mxu0 %v585_v56 }
  0x72   :  { %587 = vmatprep.subr.bf16.mxu0 %v739_v0 }
  0x75   :  { %589 = vmatpush3.bf16.msra.mxu0 %v588_v59 }
  0x76   :  { %590 = vmatprep.subr.bf16.mxu0 %v739_v0 }
  0x79   :  { %592 = vmatpush3.bf16.msra.mxu0 %v591_v62 }
  0x7a   :  { %593 = vmatprep.subr.bf16.mxu0 %v739_v0 }
  0x7d   :  { %595 = vmatpush3.bf16.msra.mxu0 %v594_v2 }
  0x7e   :  { %596 = vmatprep.subr.bf16.mxu0 %v739_v0 }
  0x81   :  { %598 = vmatpush3.bf16.msra.mxu0 %v597_v5 }
  0x82   :  { %599 = vmatprep.subr.bf16.mxu0 %v739_v0 }
  0x85   :  { %601 = vmatpush3.bf16.msra.mxu0 %v600_v8 }
  0x86   :  { %602 = vmatprep.subr.bf16.mxu0 %v739_v0 }
  0x89   :  { %604 = vmatpush3.bf16.msra.mxu0 %v603_v16 }
 0x13f   :  { %v164_v10 = vpop.f32.mrb[0].mxu0 }
 0x140   :  { %v165_v11 = vadd.f32 %v374_v9, %v164_v10  ;;  %v462_v12 = vpop.f32.mrb[1].mxu0 }
 0x142   :  { %v168_v13 = vmax.f32 %v165_v11, 0.0 }
 0x144   :  { %496 = vmatmul.mubr.f32.vlgmr.msra.gmra.mrb[0].mxu1 %v168_v13 }
 0x217   :  { %v258_v18 = vpop.f32.mrb[0].mxu1 }
 0x218   :  { %v259_v19 = vadd.f32 %v375_v17, %v258_v18  ;;  %v497_v0 = vpop.f32.mrb[1].mxu1 }
 0x21a   :  { %v262_v20 = vmax.f32 %v259_v19, 0.0 }
 0x21c   :  { %531 = vmatmul.mubr.f32.vlgmr.msra.gmra.mrb[2].mxu0 %v262_v20 }
 0x2ef   :  { %v352_v22 = vpop.f32.mrb[2].mxu0 }
 0x2f0   :  { %v353_v23 = vadd.f32 %v376_v21, %v352_v22  ;;  %v532_v24 = vpop.f32.mrb[3].mxu0 }
 0x2f2   :  { %356 = vst [vmem:[#allocation10] sm:$0xff] %v353_v23 }
 0x2f3   :  { %714 = shalt.err (!%p711_p8)
}
 0x2f4   :  { %s715_s24 = scalar_lea.hbm %s886_s5, 128 }
 0x2f5   :  { %p716_p9 = scmp.ne.s32.totalorder %s886_s5, %s715_s24  ;;  %p719_p10 = scmp.lt.u32.totalorder %s715_s24, %s886_s5 }
 0x2f7   :  { %p721_p11 = pnand %p719_p10, %p716_p9 }
 0x2f9   :  { %724 = shalt.err (!%p721_p11)
}
 0x2fa   :  { %366 = dma.vmem_to_hbm [thread:$0]  %s364_s20, 128, %s886_s5, [#allocation4]  }
 0x2fb   :  { %731 = dma.done.wait [#allocation4], 128  }
 0x2fc   :  { %732 = vsyncadd [#allocation4], 4294967168 }
 0x2fd   :  { %370 = vsyncpa [#allocation3], 1 }
 0x2fe   :  { %371 = vsyncpa [#allocation6], 1 }
 0x2ff   :  { %372 = vsyncpa [#allocation9], 1 }
 0x300   :  { %373 = vsyncpa [#allocation4], 1 }

</bundles_post_ra>
